<compile_context>
chip_gen: v6e
topology: v6e:2x2x1
jax: 0.10.0
libtpu: 0.0.40
codegen_flags: <defaults>
</compile_context>

<pallas_src>
import functools

import jax
import jax.numpy as jnp
from jax import lax
from jax.experimental import pallas as pl
from jax.experimental.pallas import tpu as pltpu


def _conv2d_kernel(x_ref, w_ref, b_ref, o_ref, *, KH, KW, Wp, T, compute_dtype):
    """One batch image per grid step.

    x_ref: (1, Cin, Lp)        flattened zero-padded image, Lp = (H+2p+1)*Wp
    w_ref: (KH*KW, Cout, Cin)  per-tap weight matrices (constant across grid)
    b_ref: (Cout, 1)           bias, f32
    o_ref: (1, Cout, T)        flattened output, T = H*Wp (pad columns are
                               junk and are sliced off in the wrapper)
    """
    x = x_ref[0]                                      # (Cin, Lp)
    if x.dtype != compute_dtype:
        x = x.astype(compute_dtype)

    acc = None
    for kh in range(KH):                              # static 3x3 unroll
        for kw in range(KW):
            t = kh * KW + kw
            off = kh * Wp + kw                        # static flat tap offset
            rhs = x[:, off:off + T]                   # (Cin, T) inputs for all outputs
            lhs = w_ref[t]                            # (Cout, Cin)
            if lhs.dtype != compute_dtype:
                lhs = lhs.astype(compute_dtype)
            part = jnp.dot(lhs, rhs, preferred_element_type=jnp.float32)
            acc = part if acc is None else acc + part

    acc = acc + b_ref[...]                            # f32 bias, lane-broadcast
    o_ref[0] = acc.astype(o_ref.dtype)


def conv2d_pallas(x, weight, bias, *, compute_dtype=None):
    """Same-padded stride-1 2D convolution matching
    nn.Conv2d(in_chans, out_chans, k, padding=(k-1)//2).  NCHW in / NCHW out."""
    N, Cin, H, W = x.shape
    Cout, Cin_w, KH, KW = weight.shape
    assert Cin_w == Cin
    assert KH == KW, "square kernels only (matches the PyTorch module)"
    assert KH % 2 == 1, "padding=(k-1)//2 is 'same' only for odd kernel sizes"
    p = (KH - 1) // 2
    out_dtype = x.dtype
    cdt = jnp.dtype(compute_dtype) if compute_dtype is not None else jnp.dtype(out_dtype)

    Wp = W + 2 * p
    Hp = H + 2 * p + 1          # one extra bottom row keeps every tap offset in-bounds
    T = H * Wp                  # flattened output width (incl. Wp-W junk cols per row)
    Lp = Hp * Wp
    assert 2 * p <= Wp          # bound check for the flat-offset scheme

    # ---- wrapper glue: tiny zero-pad + free flatten (no im2col, no transposes)
    x_pad = jnp.pad(x, ((0, 0), (0, 0), (p, p + 1), (p, p)))   # (N, Cin, Hp, Wp)
    x_flat = x_pad.reshape(N, Cin, Lp)
    # weight (Cout, Cin, KH, KW) -> (KH*KW, Cout, Cin): w_taps[kh*KW+kw, o, c]
    w_taps = jnp.transpose(weight, (2, 3, 0, 1)).reshape(KH * KW, Cout, Cin).astype(cdt)
    b2d = bias.reshape(Cout, 1).astype(jnp.float32)

    # ---- per-step VMEM footprint -> vmem limit (clamped to v7x's 64 MiB)
    x_bytes = jnp.dtype(x.dtype).itemsize
    w_bytes = jnp.dtype(cdt).itemsize
    o_bytes = jnp.dtype(out_dtype).itemsize
    step_bytes = (2 * Cin * Lp * x_bytes                       # input block, 2 buffers
                  + 2 * KH * KW * Cout * Cin * w_bytes         # weight
                  + 2 * Cout * 4                               # bias
                  + 2 * Cout * T * o_bytes)                    # output block
    vmem_limit = int(min(64 * 2**20, max(8 * 2**20, 4 * step_bytes)))

    cost = pl.CostEstimate(
        flops=int(2 * N * Cout * Cin * KH * KW * H * W),
        transcendentals=0,
        bytes_accessed=int(N * Cin * Lp * x_bytes
                           + KH * KW * Cout * Cin * w_bytes + Cout * 4
                           + N * Cout * T * o_bytes),
    )

    kernel = functools.partial(_conv2d_kernel, KH=KH, KW=KW, Wp=Wp, T=T,
                               compute_dtype=cdt)

    out_flat = pl.pallas_call(
        kernel,
        out_shape=jax.ShapeDtypeStruct((N, Cout, T), out_dtype),
        grid=(N,),
        in_specs=[
            pl.BlockSpec((1, Cin, Lp), lambda n: (n, 0, 0)),
            pl.BlockSpec((KH * KW, Cout, Cin), lambda n: (0, 0, 0)),
            pl.BlockSpec((Cout, 1), lambda n: (0, 0)),
        ],
        out_specs=pl.BlockSpec((1, Cout, T), lambda n: (n, 0, 0)),
        compiler_params=pltpu.CompilerParams(
            dimension_semantics=("parallel",),
            vmem_limit_bytes=vmem_limit,
        ),
        cost_estimate=cost,
    )(x_flat, w_taps, b2d)

    # drop the junk pad columns (free reshape + slice on HBM layout)
    out = out_flat.reshape(N, Cout, H, Wp)[:, :, :, :W]
    return out


if __name__ == "__main__":
    # Module config: in_chans=4, out_chans=8, kernel_size=3 -> padding=1
    in_chans, out_chans, kernel_size = 4, 8, 3
    N, H, W = 2, 16, 16

    key = jax.random.PRNGKey(0)
    kx, kw_key, kb = jax.random.split(key, 3)

    x = jax.random.normal(kx, (N, in_chans, H, W), dtype=jnp.float32)
    weight = jax.random.normal(
        kw_key, (out_chans, in_chans, kernel_size, kernel_size),
        dtype=jnp.float32) * 0.1
    bias = jax.random.normal(kb, (out_chans,), dtype=jnp.float32) * 0.1

    out = jax.jit(conv2d_pallas)(x, weight, bias)      # f32 operands, f32 accumulation
    out = jax.block_until_ready(out)
    assert out.shape == (N, out_chans, H, W)
    assert out.dtype == x.dtype

    pad = (kernel_size - 1) // 2
    ref = lax.conv_general_dilated(
        x, weight, window_strides=(1, 1), padding=((pad, pad), (pad, pad)),
        dimension_numbers=("NCHW", "OIHW", "NCHW"),
    ) + bias[None, :, None, None]
    max_err = float(jnp.max(jnp.abs(out - ref)))
    assert jnp.allclose(out, ref, atol=2e-2, rtol=2e-2), max_err

    print("KERNEL_OK")
</pallas_src>

<mosaic_0001>
module attributes {stable_mosaic.version = 11 : i64} {
  func.func @_conv2d_kernel(%arg0: i32, %arg1: memref<1x4x342xf32, #tpu.memory_space<vmem>>, %arg2: memref<9x8x4xf32, #tpu.memory_space<vmem>>, %arg3: memref<8x1xf32, #tpu.memory_space<vmem>>, %arg4: memref<1x8x288xf32, #tpu.memory_space<vmem>>) attributes {dimension_semantics = [#tpu.dimension_semantics<parallel>], iteration_bounds = array<i64: 2>, scalar_prefetch = 0 : i64, scratch_operands = 0 : i64, tpu.core_type = #tpu.core_type<tc>, window_params = [{transform_indices = @transform_0, window_bounds = array<i64: 1, 4, 342>}, {pipeline_mode = #tpu.pipeline_mode<synchronous>, transform_indices = @transform_1, window_bounds = array<i64: 9, 8, 4>}, {pipeline_mode = #tpu.pipeline_mode<synchronous>, transform_indices = @transform_2, window_bounds = array<i64: 8, 1>}, {transform_indices = @transform_3, window_bounds = array<i64: 1, 8, 288>}]} {
    %c0 = arith.constant 0 : index
    %c0_0 = arith.constant 0 : index
    %c0_1 = arith.constant 0 : index
    %0 = vector.load %arg1[%c0, %c0_0, %c0_1] : memref<1x4x342xf32, #tpu.memory_space<vmem>>, vector<1x4x342xf32>
    %1 = vector.shape_cast %0 : vector<1x4x342xf32> to vector<4x342xf32>
    %2 = vector.extract_strided_slice %1 {offsets = [0, 0], sizes = [4, 288], strides = [1, 1]} : vector<4x342xf32> to vector<4x288xf32>
    %c0_2 = arith.constant 0 : index
    %c0_3 = arith.constant 0 : index
    %c0_4 = arith.constant 0 : index
    %3 = vector.load %arg2[%c0_2, %c0_3, %c0_4] : memref<9x8x4xf32, #tpu.memory_space<vmem>>, vector<1x8x4xf32>
    %4 = vector.shape_cast %3 : vector<1x8x4xf32> to vector<8x4xf32>
    %cst = arith.constant dense<0.000000e+00> : vector<8x288xf32>
    %5 = tpu.matmul %4, %2, %cst {dimension_numbers = #tpu.dot_dimension_numbers<[1], [0], [0], [1], [0, 0, 1, 1], [], []>} : vector<8x4xf32>, vector<4x288xf32>, vector<8x288xf32> -> vector<8x288xf32>
    %6 = vector.extract_strided_slice %1 {offsets = [0, 1], sizes = [4, 288], strides = [1, 1]} : vector<4x342xf32> to vector<4x288xf32>
    %c1 = arith.constant 1 : index
    %c0_5 = arith.constant 0 : index
    %c0_6 = arith.constant 0 : index
    %7 = vector.load %arg2[%c1, %c0_5, %c0_6] : memref<9x8x4xf32, #tpu.memory_space<vmem>>, vector<1x8x4xf32>
    %8 = vector.shape_cast %7 : vector<1x8x4xf32> to vector<8x4xf32>
    %cst_7 = arith.constant dense<0.000000e+00> : vector<8x288xf32>
    %9 = tpu.matmul %8, %6, %cst_7 {dimension_numbers = #tpu.dot_dimension_numbers<[1], [0], [0], [1], [0, 0, 1, 1], [], []>} : vector<8x4xf32>, vector<4x288xf32>, vector<8x288xf32> -> vector<8x288xf32>
    %10 = arith.addf %5, %9 : vector<8x288xf32>
    %11 = vector.extract_strided_slice %1 {offsets = [0, 2], sizes = [4, 288], strides = [1, 1]} : vector<4x342xf32> to vector<4x288xf32>
    %c2 = arith.constant 2 : index
    %c0_8 = arith.constant 0 : index
    %c0_9 = arith.constant 0 : index
    %12 = vector.load %arg2[%c2, %c0_8, %c0_9] : memref<9x8x4xf32, #tpu.memory_space<vmem>>, vector<1x8x4xf32>
    %13 = vector.shape_cast %12 : vector<1x8x4xf32> to vector<8x4xf32>
    %cst_10 = arith.constant dense<0.000000e+00> : vector<8x288xf32>
    %14 = tpu.matmul %13, %11, %cst_10 {dimension_numbers = #tpu.dot_dimension_numbers<[1], [0], [0], [1], [0, 0, 1, 1], [], []>} : vector<8x4xf32>, vector<4x288xf32>, vector<8x288xf32> -> vector<8x288xf32>
    %15 = arith.addf %10, %14 : vector<8x288xf32>
    %16 = vector.extract_strided_slice %1 {offsets = [0, 18], sizes = [4, 288], strides = [1, 1]} : vector<4x342xf32> to vector<4x288xf32>
    %c3 = arith.constant 3 : index
    %c0_11 = arith.constant 0 : index
    %c0_12 = arith.constant 0 : index
    %17 = vector.load %arg2[%c3, %c0_11, %c0_12] : memref<9x8x4xf32, #tpu.memory_space<vmem>>, vector<1x8x4xf32>
    %18 = vector.shape_cast %17 : vector<1x8x4xf32> to vector<8x4xf32>
    %cst_13 = arith.constant dense<0.000000e+00> : vector<8x288xf32>
    %19 = tpu.matmul %18, %16, %cst_13 {dimension_numbers = #tpu.dot_dimension_numbers<[1], [0], [0], [1], [0, 0, 1, 1], [], []>} : vector<8x4xf32>, vector<4x288xf32>, vector<8x288xf32> -> vector<8x288xf32>
    %20 = arith.addf %15, %19 : vector<8x288xf32>
    %21 = vector.extract_strided_slice %1 {offsets = [0, 19], sizes = [4, 288], strides = [1, 1]} : vector<4x342xf32> to vector<4x288xf32>
    %c4 = arith.constant 4 : index
    %c0_14 = arith.constant 0 : index
    %c0_15 = arith.constant 0 : index
    %22 = vector.load %arg2[%c4, %c0_14, %c0_15] : memref<9x8x4xf32, #tpu.memory_space<vmem>>, vector<1x8x4xf32>
    %23 = vector.shape_cast %22 : vector<1x8x4xf32> to vector<8x4xf32>
    %cst_16 = arith.constant dense<0.000000e+00> : vector<8x288xf32>
    %24 = tpu.matmul %23, %21, %cst_16 {dimension_numbers = #tpu.dot_dimension_numbers<[1], [0], [0], [1], [0, 0, 1, 1], [], []>} : vector<8x4xf32>, vector<4x288xf32>, vector<8x288xf32> -> vector<8x288xf32>
    %25 = arith.addf %20, %24 : vector<8x288xf32>
    %26 = vector.extract_strided_slice %1 {offsets = [0, 20], sizes = [4, 288], strides = [1, 1]} : vector<4x342xf32> to vector<4x288xf32>
    %c5 = arith.constant 5 : index
    %c0_17 = arith.constant 0 : index
    %c0_18 = arith.constant 0 : index
    %27 = vector.load %arg2[%c5, %c0_17, %c0_18] : memref<9x8x4xf32, #tpu.memory_space<vmem>>, vector<1x8x4xf32>
    %28 = vector.shape_cast %27 : vector<1x8x4xf32> to vector<8x4xf32>
    %cst_19 = arith.constant dense<0.000000e+00> : vector<8x288xf32>
    %29 = tpu.matmul %28, %26, %cst_19 {dimension_numbers = #tpu.dot_dimension_numbers<[1], [0], [0], [1], [0, 0, 1, 1], [], []>} : vector<8x4xf32>, vector<4x288xf32>, vector<8x288xf32> -> vector<8x288xf32>
    %30 = arith.addf %25, %29 : vector<8x288xf32>
    %31 = vector.extract_strided_slice %1 {offsets = [0, 36], sizes = [4, 288], strides = [1, 1]} : vector<4x342xf32> to vector<4x288xf32>
    %c6 = arith.constant 6 : index
    %c0_20 = arith.constant 0 : index
    %c0_21 = arith.constant 0 : index
    %32 = vector.load %arg2[%c6, %c0_20, %c0_21] : memref<9x8x4xf32, #tpu.memory_space<vmem>>, vector<1x8x4xf32>
    %33 = vector.shape_cast %32 : vector<1x8x4xf32> to vector<8x4xf32>
    %cst_22 = arith.constant dense<0.000000e+00> : vector<8x288xf32>
    %34 = tpu.matmul %33, %31, %cst_22 {dimension_numbers = #tpu.dot_dimension_numbers<[1], [0], [0], [1], [0, 0, 1, 1], [], []>} : vector<8x4xf32>, vector<4x288xf32>, vector<8x288xf32> -> vector<8x288xf32>
    %35 = arith.addf %30, %34 : vector<8x288xf32>
    %36 = vector.extract_strided_slice %1 {offsets = [0, 37], sizes = [4, 288], strides = [1, 1]} : vector<4x342xf32> to vector<4x288xf32>
    %c7 = arith.constant 7 : index
    %c0_23 = arith.constant 0 : index
    %c0_24 = arith.constant 0 : index
    %37 = vector.load %arg2[%c7, %c0_23, %c0_24] : memref<9x8x4xf32, #tpu.memory_space<vmem>>, vector<1x8x4xf32>
    %38 = vector.shape_cast %37 : vector<1x8x4xf32> to vector<8x4xf32>
    %cst_25 = arith.constant dense<0.000000e+00> : vector<8x288xf32>
    %39 = tpu.matmul %38, %36, %cst_25 {dimension_numbers = #tpu.dot_dimension_numbers<[1], [0], [0], [1], [0, 0, 1, 1], [], []>} : vector<8x4xf32>, vector<4x288xf32>, vector<8x288xf32> -> vector<8x288xf32>
    %40 = arith.addf %35, %39 : vector<8x288xf32>
    %41 = vector.extract_strided_slice %1 {offsets = [0, 38], sizes = [4, 288], strides = [1, 1]} : vector<4x342xf32> to vector<4x288xf32>
    %c8 = arith.constant 8 : index
    %c0_26 = arith.constant 0 : index
    %c0_27 = arith.constant 0 : index
    %42 = vector.load %arg2[%c8, %c0_26, %c0_27] : memref<9x8x4xf32, #tpu.memory_space<vmem>>, vector<1x8x4xf32>
    %43 = vector.shape_cast %42 : vector<1x8x4xf32> to vector<8x4xf32>
    %cst_28 = arith.constant dense<0.000000e+00> : vector<8x288xf32>
    %44 = tpu.matmul %43, %41, %cst_28 {dimension_numbers = #tpu.dot_dimension_numbers<[1], [0], [0], [1], [0, 0, 1, 1], [], []>} : vector<8x4xf32>, vector<4x288xf32>, vector<8x288xf32> -> vector<8x288xf32>
    %45 = arith.addf %40, %44 : vector<8x288xf32>
    %c0_29 = arith.constant 0 : index
    %c0_30 = arith.constant 0 : index
    %46 = vector.load %arg3[%c0_29, %c0_30] : memref<8x1xf32, #tpu.memory_space<vmem>>, vector<8x1xf32>
    %47 = vector.broadcast %46 : vector<8x1xf32> to vector<8x288xf32>
    %48 = arith.addf %45, %47 : vector<8x288xf32>
    %c0_31 = arith.constant 0 : index
    %c0_32 = arith.constant 0 : index
    %c0_33 = arith.constant 0 : index
    %49 = vector.load %arg4[%c0_31, %c0_32, %c0_33] : memref<1x8x288xf32, #tpu.memory_space<vmem>>, vector<1x8x288xf32>
    %50 = vector.shape_cast %49 : vector<1x8x288xf32> to vector<8x288xf32>
    %51 = vector.shape_cast %48 : vector<8x288xf32> to vector<1x8x288xf32>
    tpu.vector_store %arg4[%c0_31, %c0_32, %c0_33], %51 {strides = array<i32>} : memref<1x8x288xf32, #tpu.memory_space<vmem>>, vector<1x8x288xf32>,
    return
  }
  func.func @transform_0(%arg0: i32) -> (i32, i32, i32) {
    %c0_i32 = arith.constant 0 : i32
    %c0_i32_0 = arith.constant 0 : i32
    %c0_i32_1 = arith.constant 0 : i32
    return %arg0, %c0_i32, %c0_i32_0 : i32, i32, i32
  }
  func.func @transform_1(%arg0: i32) -> (i32, i32, i32) {
    %c0_i32 = arith.constant 0 : i32
    %c0_i32_0 = arith.constant 0 : i32
    %c0_i32_1 = arith.constant 0 : i32
    %c0_i32_2 = arith.constant 0 : i32
    return %c0_i32, %c0_i32_0, %c0_i32_1 : i32, i32, i32
  }
  func.func @transform_2(%arg0: i32) -> (i32, i32) {
    %c0_i32 = arith.constant 0 : i32
    %c0_i32_0 = arith.constant 0 : i32
    %c0_i32_1 = arith.constant 0 : i32
    return %c0_i32, %c0_i32_0 : i32, i32
  }
  func.func @transform_3(%arg0: i32) -> (i32, i32, i32) {
    %c0_i32 = arith.constant 0 : i32
    %c0_i32_0 = arith.constant 0 : i32
    %c0_i32_1 = arith.constant 0 : i32
    return %arg0, %c0_i32, %c0_i32_0 : i32, i32, i32
  }
}

</mosaic_0001>

<bundles_post_ra>
// kernel: conv2d_pallas.1
= control target key start
LH: loop header
LB: loop body
LE: loop exit
PB: predicated region body
PF: predicated region fallthrough
CT: control target
= control target key end

     0   :  { %s1893_s12 = smov 0   ;;  %s2044_s0 = inlined_call_operand.vmem [shape: f32[2,4,342], index: 0, kind: input, shape index: {}]   ;;  %s2045_s1 = inlined_call_operand.vmem [shape: f32[9,8,4], index: 1, kind: input, shape index: {}]   ;;  %s2046_s2 = inlined_call_operand.vmem [shape: f32[8,1], index: 2, kind: input, shape index: {}]   ;;  %s2047_s3 = inlined_call_operand.vmem [shape: f32[2,8,288], index: 3, kind: output, shape index: {}]  }
   0x1 LB: > { %s1706_s13 = sadd.s32 4294967295, %s1860_s12   ;;  %p1710_p0 = scmp.ge.s32.totalorder %s1860_s12, 1  ;;  %s1860_s12 = sphi %s1893_s12, %s13_s12  }
   0x2   : > { %p137_p1 = scmp.lt.s32.totalorder %s1860_s12, 3 }
   0x4   : > { %p138_p2 = pnand %p1710_p0, %p137_p1 }
   0x5   : > { %p161_p3 = scmp.lt.s32.totalorder (!%p138_p2), %s1706_s13, 1  ;;  %s1864_s18 = smov (!%p138_p2), 127  }
   0x6   : > { %141 = sbr.rel (%p138_p2) target bundleno = 378 (0x17a), region = 32  ;;  %s1865_s19 = smov (!%p138_p2), 126  }
   0x7   : > { %s1866_s20 = smov (!%p138_p2), 110   ;;  %s1867_s21 = smov (!%p138_p2), 109  }
   0x8   : > { %s1868_s22 = smov (!%p138_p2), 108   ;;  %s1869_s23 = smov (!%p138_p2), 92  }
   0x9   : > { %s1871_s24 = smov (!%p138_p2), 91   ;;  %s1872_s25 = smov (!%p138_p2), 90  }
   0xb   : > { %v1862_v0 = vmov 0.0   ;;  %vm1863_vm0 = vmmov 0   ;;  %s2049_s13 = smov (!%p161_p3, %s1706_s13), 1  ;;  %v1870_v4 = vmov 0   ;;  %v1638_v5 = vld [vmem:[%s2046_s2] sm:$0xff]  ;;  %vm192_vm1 = vcmask 1043456  }
   0xc   : > { %1786 = vmatprep.subr.mxu1 %v1862_v0  ;;  %1788 = vmatprep.mubr.msk.f32.mxu1 %vm1863_vm0, %v1862_v0  ;;  %s1831_s14 = smul.u32 12, %s2049_s13  ;;  %v1713_v6 = vld [vmem:[%s2045_s1 + $0x8] sm:$0xff]  ;;  %vm188_vm2 = vcmask 31744   ;;  %v173_v9 = vld [vmem:[%s2045_s1] sm:$0xff]  ;;  %vm185_vm3 = vcmask 1039360   ;;  %v1724_v12 = vld [vmem:[%s2045_s1 + $0x10] sm:$0xff] }
   0xd   : > { %263 = vmatprep.mubr.f32.mxu0 %v1862_v0  ;;  %1852 = vset.pattern.permute.xlu0 %v1870_v4  ;;  %vm498_vm4 = vcmask 1031168   ;;  %v1730_v19 = vld [vmem:[%s2045_s1 + $0x18] sm:$0xff]  ;;  %vm662_vm5 = vcmask 900096   ;;  %vm826_vm6 = vcmask 891904   ;;  %v1736_v28 = vld [vmem:[%s2045_s1 + $0x20] sm:$0xff]  ;;  %vm990_vm7 = vcmask 883712  }
   0xe   : > { %s165_s17 = scalar_lea.vmem %s2044_s0, %s1831_s14  ;;  %v1742_v33 = vld [vmem:[%s2045_s1 + $0x28] sm:$0xff]  ;;  %vm1154_vm8 = vcmask 752640   ;;  %v1748_v38 = vld [vmem:[%s2045_s1 + $0x30] sm:$0xff]  ;;  %vm1318_vm9 = vcmask 744448   ;;  %v1754_v43 = vld [vmem:[%s2045_s1 + $0x38] sm:$0xff]  ;;  %vm1482_vm10 = vcmask 736256  }
   0xf   : > { %v172_v1 = vld [vmem:[%s165_s17 + $0x8] sm:$0xf]  ;;  %v1911_v2 = vld [vmem:[%s165_s17] sm:$0xff]  ;;  %vm1649_vm11 = vcmask 261120  }
  0x10   : > { %183 = vrot.lane.b32.xlu0 %v172_v1, %s1864_s18  ;;  %179 = vrot.lane.b32.xlu1 %v1911_v2, %s1864_s18  ;;  %v178_v3 = vcombine.high %v1911_v2, %v1911_v2  ;;  %v1760_v50 = vld [vmem:[%s2045_s1 + $0x40] sm:$0xff] }
  0x14   : > { %496 = vrot.lane.b32.xlu0 %v172_v1, %s1865_s19  ;;  %492 = vrot.lane.b32.xlu1 %v1911_v2, %s1865_s19 }
  0x18   : > { %494 = vrot.lane.b32.xlu1 %v178_v3, %s1865_s19  ;;  %181 = vrot.lane.b32.xlu0 %v178_v3, %s1864_s18 }
  0x1c   : > { %660 = vrot.lane.b32.xlu1 %v172_v1, %s1866_s20  ;;  %658 = vrot.lane.b32.xlu0 %v178_v3, %s1866_s20 }
  0x20   : > { %822 = vrot.lane.b32.xlu1 %v178_v3, %s1867_s21  ;;  %656 = vrot.lane.b32.xlu0 %v1911_v2, %s1866_s20 }
  0x24   : > { %820 = vrot.lane.b32.xlu1 %v1911_v2, %s1867_s21  ;;  %824 = vrot.lane.b32.xlu0 %v172_v1, %s1867_s21  ;;  %s1832_s21 = smul.u32 24, %s2049_s13 }
  0x28   : > { %988 = vrot.lane.b32.xlu1 %v172_v1, %s1868_s22  ;;  %986 = vrot.lane.b32.xlu0 %v178_v3, %s1868_s22 }
  0x2c   : > { %1150 = vrot.lane.b32.xlu1 %v178_v3, %s1869_s23  ;;  %984 = vrot.lane.b32.xlu0 %v1911_v2, %s1868_s22 }
  0x30   : > { %1148 = vrot.lane.b32.xlu1 %v1911_v2, %s1869_s23  ;;  %1152 = vrot.lane.b32.xlu0 %v172_v1, %s1869_s23 }
  0x34   : > { %1316 = vrot.lane.b32.xlu1 %v172_v1, %s1871_s24  ;;  %1314 = vrot.lane.b32.xlu0 %v178_v3, %s1871_s24 }
  0x38   : > { %1478 = vrot.lane.b32.xlu1 %v178_v3, %s1872_s25  ;;  %1312 = vrot.lane.b32.xlu0 %v1911_v2, %s1871_s24  ;;  %s170_s24 = scalar_lea.vmem %s2047_s3, %s1832_s21 }
  0x3c   : > { %1476 = vrot.lane.b32.xlu1 %v1911_v2, %s1872_s25  ;;  %1480 = vrot.lane.b32.xlu0 %v172_v1, %s1872_s25 }
  0x40   : > { %1641 = vperm.xlu0 %1852, %v1638_v5  }
  0x82   : > { %v184_v7 = vpop.permute.xlu0 %183  ;;  %v180_v8 = vpop.permute.xlu1 %179 }
  0x83   : > { %1787 = vmatpush3.msk.msra.mxu1 %vm192_vm1, %v184_v7 }
  0x84   : > { %1789 = vmatmul.mubr.msk.f32.vlgmr.msra.gmra.mxu1 %vm188_vm2, %v1713_v6  ;;  %1791 = vmatprep.subr.mxu1 %v1862_v0 }
  0x85   : > { %1792 = vmatpush3.msk.msra.mxu1 %vm192_vm1, %v172_v1  ;;  %1793 = vmatprep.mubr.msk.f32.mxu1 %vm1863_vm0, %v1862_v0 }
  0x86   : > { %v497_v10 = vpop.permute.xlu0 %496  ;;  %v493_v11 = vpop.permute.xlu1 %492  ;;  %1796 = vmatprep.subr.mxu1 %v1862_v0 }
  0x88   : > { %1794 = vmatmul.mubr.msk.f32.vlgmr.msra.gmra.mxu1 %vm188_vm2, %v173_v9 }
  0x89   : > { %1797 = vmatpush3.msk.msra.mxu1 %vm192_vm1, %v497_v10  ;;  %1798 = vmatprep.mubr.msk.f32.mxu1 %vm1863_vm0, %v1862_v0 }
  0x8a   : > { %v495_v13 = vpop.permute.xlu1 %494  ;;  %v182_v14 = vpop.permute.xlu0 %181  ;;  %1801 = vmatprep.subr.mxu1 %v1862_v0 }
  0x8b   : > { %v187_v15 = vsel %vm185_vm3, %v182_v14, %v184_v7  ;;  %v186_v16 = vsel %vm185_vm3, %v180_v8, %v182_v14  ;;  %v500_v20 = vsel %vm498_vm4, %v495_v13, %v497_v10  ;;  %v499_v21 = vsel %vm498_vm4, %v493_v11, %v495_v13 }
  0x8c   : > { %1714 = vmatprep.subr.msk.mxu0 %vm192_vm1, %v187_v15  ;;  %1799 = vmatmul.mubr.msk.f32.vlgmr.msra.gmra.mxu1 %vm188_vm2, %v1724_v12 }
  0x8d   : > { %1715 = vmatpush1.msk.msra.mxu0 %vm192_vm1, %v186_v16  ;;  %1803 = vmatprep.mubr.msk.f32.mxu1 %vm1863_vm0, %v1862_v0 }
  0x8e   : > { %v661_v17 = vpop.permute.xlu1 %660  ;;  %1716 = vmatmul.mubr.msk.f32.vlgmr.msra.gmra.mxu0 %vm188_vm2, %v1713_v6  ;;  %1719 = vmatprep.subr.msk.mxu0 %vm192_vm1, %v178_v3  ;;  %v659_v18 = vpop.permute.xlu0 %658 }
  0x8f   : > { %1720 = vmatpush1.msk.msra.mxu0 %vm192_vm1, %v1911_v2  ;;  %1802 = vmatpush3.msk.msra.mxu1 %vm192_vm1, %v661_v17  ;;  %v664_v24 = vsel %vm662_vm5, %v659_v18, %v661_v17 }
  0x90   : > { %1725 = vmatprep.subr.msk.mxu0 %vm192_vm1, %v500_v20  ;;  %413 = vmatprep.mubr.f32.mxu0 %v1862_v0 }
  0x91   : > { %1806 = vmatprep.subr.mxu1 %v1862_v0  ;;  %1804 = vmatmul.mubr.msk.f32.vlgmr.msra.gmra.mxu1 %vm188_vm2, %v1730_v19 }
  0x92   : > { %v823_v22 = vpop.permute.xlu1 %822  ;;  %1721 = vmatmul.mubr.msk.f32.vlgmr.msra.gmra.mxu0 %vm188_vm2, %v173_v9  ;;  %v657_v23 = vpop.permute.xlu0 %656  ;;  %1808 = vmatprep.mubr.msk.f32.mxu1 %vm1863_vm0, %v1862_v0 }
  0x93   : > { %1726 = vmatpush1.msk.msra.mxu0 %vm192_vm1, %v499_v21  ;;  %574 = vmatprep.mubr.f32.mxu0 %v1862_v0  ;;  %v663_v25 = vsel %vm662_vm5, %v657_v23, %v659_v18 }
  0x94   : > { %1731 = vmatprep.subr.msk.mxu0 %vm192_vm1, %v664_v24 }
  0x96   : > { %v821_v26 = vpop.permute.xlu1 %820  ;;  %1727 = vmatmul.mubr.msk.f32.vlgmr.msra.gmra.mxu0 %vm188_vm2, %v1724_v12  ;;  %v825_v27 = vpop.permute.xlu0 %824 }
  0x97   : > { %1732 = vmatpush1.msk.msra.mxu0 %vm192_vm1, %v663_v25  ;;  %v828_v29 = vsel %vm826_vm6, %v823_v22, %v825_v27  ;;  %1807 = vmatpush3.msk.msra.mxu1 %vm192_vm1, %v825_v27  ;;  %v827_v30 = vsel %vm826_vm6, %v821_v26, %v823_v22 }
  0x98   : > { %1737 = vmatprep.subr.msk.mxu0 %vm192_vm1, %v828_v29  ;;  %738 = vmatprep.mubr.f32.mxu0 %v1862_v0 }
  0x99   : > { %1809 = vmatmul.mubr.msk.f32.vlgmr.msra.gmra.mxu1 %vm188_vm2, %v1736_v28  ;;  %1811 = vmatprep.subr.mxu1 %v1862_v0 }
  0x9a   : > { %v989_v31 = vpop.permute.xlu1 %988  ;;  %1733 = vmatmul.mubr.msk.f32.vlgmr.msra.gmra.mxu0 %vm188_vm2, %v1730_v19  ;;  %v987_v32 = vpop.permute.xlu0 %986  ;;  %1813 = vmatprep.mubr.msk.f32.mxu1 %vm1863_vm0, %v1862_v0 }
  0x9b   : > { %1738 = vmatpush1.msk.msra.mxu0 %vm192_vm1, %v827_v30  ;;  %v992_v34 = vsel %vm990_vm7, %v987_v32, %v989_v31  ;;  %1812 = vmatpush3.msk.msra.mxu1 %vm192_vm1, %v989_v31 }
  0x9c   : > { %1743 = vmatprep.subr.msk.mxu0 %vm192_vm1, %v992_v34  ;;  %902 = vmatprep.mubr.f32.mxu0 %v1862_v0 }
  0x9d   : > { %1814 = vmatmul.mubr.msk.f32.vlgmr.msra.gmra.mxu1 %vm188_vm2, %v1742_v33  ;;  %1816 = vmatprep.subr.mxu1 %v1862_v0 }
  0x9e   : > { %v1151_v35 = vpop.permute.xlu1 %1150  ;;  %1739 = vmatmul.mubr.msk.f32.vlgmr.msra.gmra.mxu0 %vm188_vm2, %v1736_v28  ;;  %v985_v36 = vpop.permute.xlu0 %984  ;;  %1818 = vmatprep.mubr.msk.f32.mxu1 %vm1863_vm0, %v1862_v0 }
  0x9f   : > { %v991_v37 = vsel %vm990_vm7, %v985_v36, %v987_v32  ;;  %1066 = vmatprep.mubr.f32.mxu0 %v1862_v0 }
  0xa0   : > { %1744 = vmatpush1.msk.msra.mxu0 %vm192_vm1, %v991_v37 }
  0xa2   : > { %v1149_v39 = vpop.permute.xlu1 %1148  ;;  %1745 = vmatmul.mubr.msk.f32.vlgmr.msra.gmra.mxu0 %vm188_vm2, %v1742_v33  ;;  %v1153_v40 = vpop.permute.xlu0 %1152 }
  0xa3   : > { %v1155_v41 = vsel %vm1154_vm8, %v1149_v39, %v1151_v35  ;;  %v1156_v42 = vsel %vm1154_vm8, %v1151_v35, %v1153_v40  ;;  %1817 = vmatpush3.msk.msra.mxu1 %vm192_vm1, %v1153_v40  ;;  %1230 = vmatprep.mubr.f32.mxu0 %v1862_v0 }
  0xa4   : > { %1749 = vmatprep.subr.msk.mxu0 %vm192_vm1, %v1156_v42  ;;  %1819 = vmatmul.mubr.msk.f32.vlgmr.msra.gmra.mxu1 %vm188_vm2, %v1748_v38 }
  0xa5   : > { %1750 = vmatpush1.msk.msra.mxu0 %vm192_vm1, %v1155_v41  ;;  %1821 = vmatprep.subr.mxu1 %v1862_v0 }
  0xa6   : > { %v1317_v44 = vpop.permute.xlu1 %1316  ;;  %1751 = vmatmul.mubr.msk.f32.vlgmr.msra.gmra.mxu0 %vm188_vm2, %v1748_v38  ;;  %v1315_v45 = vpop.permute.xlu0 %1314  ;;  %1823 = vmatprep.mubr.msk.f32.mxu1 %vm1863_vm0, %v1862_v0 }
  0xa7   : > { %v1320_v46 = vsel %vm1318_vm9, %v1315_v45, %v1317_v44  ;;  %1822 = vmatpush3.msk.msra.mxu1 %vm192_vm1, %v1317_v44  ;;  %1394 = vmatprep.mubr.f32.mxu0 %v1862_v0 }
  0xa8   : > { %1755 = vmatprep.subr.msk.mxu0 %vm192_vm1, %v1320_v46  ;;  %1824 = vmatmul.mubr.msk.f32.vlgmr.msra.gmra.mxu1 %vm188_vm2, %v1754_v43 }
  0xa9   : > { %1826 = vmatprep.subr.mxu1 %v1862_v0  ;;  %1828 = vmatprep.mubr.msk.f32.mxu1 %vm1863_vm0, %v1862_v0 }
  0xaa   : > { %v1479_v47 = vpop.permute.xlu1 %1478  ;;  %v1313_v48 = vpop.permute.xlu0 %1312 }
  0xab   : > { %v1319_v49 = vsel %vm1318_vm9, %v1313_v48, %v1315_v45 }
  0xac   : > { %1756 = vmatpush1.msk.msra.mxu0 %vm192_vm1, %v1319_v49 }
  0xad   : > { %1757 = vmatmul.mubr.msk.f32.vlgmr.msra.gmra.mxu0 %vm188_vm2, %v1754_v43 }
  0xae   : > { %v1477_v51 = vpop.permute.xlu1 %1476  ;;  %v1481_v52 = vpop.permute.xlu0 %1480  ;;  %1558 = vmatprep.mubr.f32.mxu0 %v1862_v0 }
  0xaf   : > { %v1483_v53 = vsel %vm1482_vm10, %v1477_v51, %v1479_v47  ;;  %v1484_v54 = vsel %vm1482_vm10, %v1479_v47, %v1481_v52  ;;  %1827 = vmatpush3.msk.msra.mxu1 %vm192_vm1, %v1481_v52 }
  0xb0   : > { %1761 = vmatprep.subr.msk.mxu0 %vm192_vm1, %v1484_v54  ;;  %1829 = vmatmul.mubr.msk.f32.vlgmr.msra.gmra.mxu1 %vm188_vm2, %v1760_v50 }
  0xb1   : > { %1762 = vmatpush1.msk.msra.mxu0 %vm192_vm1, %v1483_v53 }
  0xb2   : > { %1763 = vmatmul.mubr.msk.f32.vlgmr.msra.gmra.mxu0 %vm188_vm2, %v1760_v50 }
  0xbb   : > { %v1642_v42 = vpop.permute.xlu0 %1641 }
 0x144   : > { %v336_v55 = vpop.f32.mrf.mxu1 }
 0x146   : > { %v1790_v56 = vpop.f32.mrf.mxu1 }
 0x148   : > { %v486_v57 = vpop.f32.mrf.mxu1 }
 0x149   : > { %v487_v7 = vadd.f32 %v486_v57, %v336_v55 }
 0x14a   : > { %v1795_v58 = vpop.f32.mrf.mxu1 }
 0x14c   : > { %v647_v59 = vpop.f32.mrf.mxu1 }
 0x14d   : > { %v653_v12 = vadd.f32 %v647_v59, %v487_v7 }
 0x14e   : > { %v265_v60 = vpop.f32.mrf.mxu0  ;;  %v1800_v61 = vpop.f32.mrf.mxu1 }
 0x150   : > { %v267_v62 = vpop.f32.mrf.mxu0 }
 0x151   : > { %v811_v63 = vpop.f32.mrf.mxu1 }
 0x152   : > { %v415_v0 = vpop.f32.mrf.mxu0  ;;  %v817_v16 = vadd.f32 %v811_v63, %v653_v12 }
 0x153   : > { %v1805_v1 = vpop.f32.mrf.mxu1  ;;  %v416_v19 = vadd.f32 %v415_v0, %v265_v60 }
 0x154   : > { %v417_v2 = vpop.f32.mrf.mxu0 }
 0x155   : > { %v418_v21 = vadd.f32 %v417_v2, %v267_v62 }
 0x156   : > { %v576_v3 = vpop.f32.mrf.mxu0 }
 0x157   : > { %v651_v22 = vadd.f32 %v576_v3, %v416_v19 }
 0x158   : > { %v578_v4 = vpop.f32.mrf.mxu0 }
 0x159   : > { %v975_v5 = vpop.f32.mrf.mxu1  ;;  %v652_v26 = vadd.f32 %v578_v4, %v418_v21 }
 0x15a   : > { %v740_v6 = vpop.f32.mrf.mxu0  ;;  %v981_v23 = vadd.f32 %v975_v5, %v817_v16 }
 0x15b   : > { %v1810_v8 = vpop.f32.mrf.mxu1  ;;  %v815_v27 = vadd.f32 %v740_v6, %v651_v22 }
 0x15c   : > { %v742_v9 = vpop.f32.mrf.mxu0 }
 0x15d   : > { %v1139_v10 = vpop.f32.mrf.mxu1  ;;  %v816_v29 = vadd.f32 %v742_v9, %v652_v26 }
 0x15e   : > { %v904_v11 = vpop.f32.mrf.mxu0  ;;  %v1145_v31 = vadd.f32 %v1139_v10, %v981_v23 }
 0x15f   : > { %v1815_v13 = vpop.f32.mrf.mxu1  ;;  %v979_v30 = vadd.f32 %v904_v11, %v815_v27 }
 0x160   : > { %v906_v14 = vpop.f32.mrf.mxu0 }
 0x161   : > { %v980_v33 = vadd.f32 %v906_v14, %v816_v29 }
 0x162   : > { %v1068_v15 = vpop.f32.mrf.mxu0 }
 0x163   : > { %v1143_v34 = vadd.f32 %v1068_v15, %v979_v30 }
 0x164   : > { %v1070_v17 = vpop.f32.mrf.mxu0  ;;  %v1303_v18 = vpop.f32.mrf.mxu1 }
 0x165   : > { %v1309_v35 = vadd.f32 %v1303_v18, %v1145_v31  ;;  %v1144_v37 = vadd.f32 %v1070_v17, %v980_v33 }
 0x166   : > { %v1820_v20 = vpop.f32.mrf.mxu1  ;;  %v1232_v24 = vpop.f32.mrf.mxu0 }
 0x167   : > { %v1307_v38 = vadd.f32 %v1232_v24, %v1143_v34 }
 0x168   : > { %v1467_v25 = vpop.f32.mrf.mxu1  ;;  %v1234_v32 = vpop.f32.mrf.mxu0 }
 0x169   : > { %v1473_v39 = vadd.f32 %v1467_v25, %v1309_v35  ;;  %v1308_v43 = vadd.f32 %v1234_v32, %v1144_v37 }
 0x16a   : > { %v1825_v28 = vpop.f32.mrf.mxu1 }
 0x16d   : > { %v1396_v36 = vpop.f32.mrf.mxu0 }
 0x16e   : > { %v1471_v44 = vadd.f32 %v1396_v36, %v1307_v38 }
 0x16f   : > { %v1398_v40 = vpop.f32.mrf.mxu0 }
 0x170   : > { %v1631_v41 = vpop.f32.mrf.mxu1  ;;  %v1472_v48 = vadd.f32 %v1398_v40, %v1308_v43 }
 0x171   : > { %v1637_v45 = vadd.f32 %v1631_v41, %v1473_v39 }
 0x172   : > { %v1560_v46 = vpop.f32.mrf.mxu0  ;;  %v1830_v47 = vpop.f32.mrf.mxu1 }
 0x173   : > { %v1635_v49 = vadd.f32 %v1560_v46, %v1471_v44  ;;  %v1646_v50 = vadd.f32 %v1642_v42, %v1637_v45 }
 0x174   : > { %v1562_v51 = vpop.f32.mrf.mxu0 }
 0x175   : > { %v1644_v52 = vadd.f32 %v1642_v42, %v1635_v49  ;;  %1650 = vst.msk [vmem:[%s170_s24 + $0x10] sm:$0xff] %vm1649_vm11, %v1646_v50  ;;  %v1636_v53 = vadd.f32 %v1562_v51, %v1472_v48 }
 0x177   : > { %1647 = vst [vmem:[%s170_s24] sm:$0xff] %v1644_v52  ;;  %v1645_v54 = vadd.f32 %v1642_v42, %v1636_v53 }
 0x179   : > { %1648 = vst [vmem:[%s170_s24 + $0x8] sm:$0xff] %v1645_v54 }
 0x17a PF: > { %s13_s12 = sadd.s32 1, %s1860_s12  }
 0x17b   : > { %p10_p4 = scmp.ge.s32.totalorder %s13_s12, 4  }
 0x17d   :  { %12 = sbr.rel (!%p10_p4) target bundleno = 1 (0x1), region = 70 }

</bundles_post_ra>
